<compile_context>
chip_gen: v7x
topology: tpu7x:2x2x1
jax: 0.10.0
libtpu: 0.0.40
codegen_flags: <defaults>
</compile_context>

<pallas_src>
import math

import jax
import jax.numpy as jnp
from jax import lax
from jax.experimental import pallas as pl
from jax.experimental.pallas import tpu as pltpu

_INV_SQRT2 = 0.7071067811865476
# Abramowitz & Stegun 7.1.26 coefficients (|error| < 1.5e-7).
_A1, _A2, _A3, _A4, _A5 = 0.254829592, -0.284496736, 1.421413741, -1.453152027, 1.061405429
_P = 0.3275911


def _gelu_exact_f32(y):
    # 0.5 * y * (1 + erf(y / sqrt(2)))  -- PyTorch-default exact GELU.
    x = y * _INV_SQRT2
    ax = jnp.abs(x)
    t = 1.0 / (1.0 + _P * ax)
    poly = ((((_A5 * t + _A4) * t + _A3) * t + _A2) * t + _A1) * t
    erf_ax = 1.0 - poly * jnp.exp(-(ax * ax))          # erf(|x|)
    erf_x = jnp.where(x < 0.0, -erf_ax, erf_ax)
    return 0.5 * y * (1.0 + erf_x)


def _bert_intermediate_kernel(x_ref, w_ref, b_ref, o_ref):
    # x: (tm, H) bf16, w: (tn, H) bf16 (torch Linear layout) -> NT matmul on MXU.
    y = lax.dot_general(
        x_ref[...], w_ref[...],
        dimension_numbers=(((1,), (1,)), ((), ())),
        preferred_element_type=jnp.float32)            # (tm, tn) f32 accumulate
    y = y + b_ref[...]                                  # (1, tn) bias broadcast
    o_ref[...] = _gelu_exact_f32(y).astype(o_ref.dtype)


def _round_up(x, m):
    return ((x + m - 1) // m) * m


def _select_tiles(M, H, I_pad, xw_bytes, o_bytes, budget_bytes):
    """Pick (tm, tn): prefer the largest N panel (W residency), then largest tm."""
    tm0 = min(256, _round_up(max(M, 1), 16))
    tn_cands = sorted({c for c in (I_pad, 4096, 2048, 1024, 512, 256, 128)
                       if c <= I_pad and I_pad % c == 0}, reverse=True)

    def vmem(tm, tn):  # double-buffered x, w, bias, out blocks
        return 2 * (tm * H * xw_bytes + tn * H * xw_bytes + tn * 4 + tm * tn * o_bytes)

    for tn in tn_cands:
        tm = tm0
        while tm >= 16:
            if vmem(tm, tn) <= budget_bytes:
                return tm, tn
            tm //= 2
    return 16, tn_cands[-1]


def bert_intermediate(hidden_states, weight, bias, *, out_dtype=None,
                      mxu_dtype=jnp.bfloat16):
    """Fused Linear + exact GELU.

    hidden_states: (..., hidden_size)
    weight:        (intermediate_size, hidden_size)   -- torch.nn.Linear layout
    bias:          (intermediate_size,)
    """
    *lead, H = hidden_states.shape
    I = weight.shape[0]
    assert weight.shape == (I, H)
    M = math.prod(lead) if lead else 1
    out_dtype = out_dtype if out_dtype is not None else hidden_states.dtype

    # bf16 MXU operands (halves HBM bytes, full MXU rate); f32 accumulation in-kernel.
    x2 = hidden_states.reshape(M, H).astype(mxu_dtype)
    w = weight.astype(mxu_dtype)                    # keep (I, H): no per-call transpose
    b2 = bias.astype(jnp.float32).reshape(1, I)

    xw_bytes = jnp.dtype(mxu_dtype).itemsize
    o_bytes = jnp.dtype(out_dtype).itemsize

    I_pad = _round_up(I, 128)
    tm, tn = _select_tiles(M, H, I_pad, xw_bytes, o_bytes, budget_bytes=28 << 20)
    M_pad = _round_up(M, tm)

    if M_pad != M:
        x2 = jnp.pad(x2, ((0, M_pad - M), (0, 0)))
    if I_pad != I:
        w = jnp.pad(w, ((0, I_pad - I), (0, 0)))
        b2 = jnp.pad(b2, ((0, 0), (0, I_pad - I)))

    # Grid: j (output-N panels) outer, i (token tiles) inner -> the W panel's block
    # index is constant across i, so it stays VMEM-resident (DMA'd once per panel).
    grid = (I_pad // tn, M_pad // tm)

    grid_spec = pltpu.PrefetchScalarGridSpec(
        num_scalar_prefetch=0,
        grid=grid,
        in_specs=[
            pl.BlockSpec((tm, H), lambda j, i: (i, 0)),     # activations, full K
            pl.BlockSpec((tn, H), lambda j, i: (j, 0)),     # weight panel (resident)
            pl.BlockSpec((1, tn), lambda j, i: (0, j)),     # bias
        ],
        out_specs=pl.BlockSpec((tm, tn), lambda j, i: (i, j)),
    )

    cost = pl.CostEstimate(
        flops=2 * M_pad * H * I_pad,
        transcendentals=M_pad * I_pad,
        bytes_accessed=(M_pad * H * xw_bytes + I_pad * H * xw_bytes
                        + I_pad * 4 + M_pad * I_pad * o_bytes),
    )

    out = pl.pallas_call(
        _bert_intermediate_kernel,
        out_shape=jax.ShapeDtypeStruct((M_pad, I_pad), out_dtype),
        grid_spec=grid_spec,
        compiler_params=pltpu.CompilerParams(
            dimension_semantics=("parallel", "parallel"),
            vmem_limit_bytes=48 << 20),
        cost_estimate=cost,
    )(x2, w, b2)

    out = out[:M, :I]
    return out.reshape(*lead, I)


if __name__ == "__main__":
    # Small BERT-ish config (hidden=128, intermediate=4*hidden=512).
    B, S = 2, 8
    hidden_size = 128
    intermediate_size = 512

    key = jax.random.PRNGKey(0)
    kx, kw, kb = jax.random.split(key, 3)
    hidden_states = jax.random.normal(kx, (B, S, hidden_size), jnp.float32)
    weight = 0.02 * jax.random.normal(kw, (intermediate_size, hidden_size), jnp.float32)
    bias = 0.02 * jax.random.normal(kb, (intermediate_size,), jnp.float32)

    out = bert_intermediate(hidden_states, weight, bias)
    out = jax.block_until_ready(out)

    assert out.shape == (B, S, intermediate_size)
    assert out.dtype == hidden_states.dtype

    # Reference uses the same bf16 operand quantization as the kernel's MXU path
    # (f32 accumulation) and exact-erf GELU, matching torch F.gelu semantics.
    ref = jax.nn.gelu(
        jnp.einsum("bsh,ih->bsi",
                   hidden_states.astype(jnp.bfloat16),
                   weight.astype(jnp.bfloat16),
                   preferred_element_type=jnp.float32) + bias,
        approximate=False)

    max_err = float(jnp.max(jnp.abs(out - ref)))
    assert jnp.allclose(out, ref, atol=2e-3, rtol=2e-3), max_err
    print("KERNEL_OK")
</pallas_src>

<mosaic_0001>
module attributes {stable_mosaic.version = 11 : i64} {
  func.func @_bert_intermediate_kernel(%arg0: i32, %arg1: i32, %arg2: memref<16x128xbf16, #tpu.memory_space<vmem>>, %arg3: memref<512x128xbf16, #tpu.memory_space<vmem>>, %arg4: memref<1x512xf32, #tpu.memory_space<vmem>>, %arg5: memref<16x512xf32, #tpu.memory_space<vmem>>) attributes {dimension_semantics = [#tpu.dimension_semantics<parallel>, #tpu.dimension_semantics<parallel>], iteration_bounds = array<i64: 1, 1>, scalar_prefetch = 0 : i64, scratch_operands = 0 : i64, tpu.core_type = #tpu.core_type<tc>, window_params = [{transform_indices = @transform_0, window_bounds = array<i64: 16, 128>}, {transform_indices = @transform_1, window_bounds = array<i64: 512, 128>}, {transform_indices = @transform_2, window_bounds = array<i64: 1, 512>}, {transform_indices = @transform_3, window_bounds = array<i64: 16, 512>}]} {
    %c0 = arith.constant 0 : index
    %c0_0 = arith.constant 0 : index
    %0 = vector.load %arg2[%c0, %c0_0] : memref<16x128xbf16, #tpu.memory_space<vmem>>, vector<16x128xbf16>
    %c0_1 = arith.constant 0 : index
    %c0_2 = arith.constant 0 : index
    %1 = vector.load %arg3[%c0_1, %c0_2] : memref<512x128xbf16, #tpu.memory_space<vmem>>, vector<512x128xbf16>
    %cst = arith.constant dense<0.000000e+00> : vector<16x512xf32>
    %2 = tpu.matmul %0, %1, %cst {dimension_numbers = #tpu.dot_dimension_numbers<[1], [1], [0], [0], [0, 0, 1, 0], [], []>} : vector<16x128xbf16>, vector<512x128xbf16>, vector<16x512xf32> -> vector<16x512xf32>
    %c0_3 = arith.constant 0 : index
    %c0_4 = arith.constant 0 : index
    %3 = vector.load %arg4[%c0_3, %c0_4] : memref<1x512xf32, #tpu.memory_space<vmem>>, vector<1x512xf32>
    %4 = vector.broadcast %3 : vector<1x512xf32> to vector<16x512xf32>
    %5 = arith.addf %2, %4 : vector<16x512xf32>
    %cst_5 = arith.constant 0.707106769 : f32
    %6 = vector.broadcast %cst_5 : f32 to vector<16x512xf32>
    %7 = arith.mulf %5, %6 : vector<16x512xf32>
    %8 = math.absf %7 : vector<16x512xf32>
    %cst_6 = arith.constant 0.327591091 : f32
    %9 = vector.broadcast %cst_6 : f32 to vector<16x512xf32>
    %10 = arith.mulf %9, %8 : vector<16x512xf32>
    %cst_7 = arith.constant 1.000000e+00 : f32
    %11 = vector.broadcast %cst_7 : f32 to vector<16x512xf32>
    %12 = arith.addf %11, %10 : vector<16x512xf32>
    %cst_8 = arith.constant 1.000000e+00 : f32
    %13 = vector.broadcast %cst_8 : f32 to vector<16x512xf32>
    %14 = arith.divf %13, %12 : vector<16x512xf32>
    %cst_9 = arith.constant 1.06140542 : f32
    %15 = vector.broadcast %cst_9 : f32 to vector<16x512xf32>
    %16 = arith.mulf %15, %14 : vector<16x512xf32>
    %cst_10 = arith.constant -1.45315206 : f32
    %17 = vector.broadcast %cst_10 : f32 to vector<16x512xf32>
    %18 = arith.addf %16, %17 : vector<16x512xf32>
    %19 = arith.mulf %18, %14 : vector<16x512xf32>
    %cst_11 = arith.constant 1.42141378 : f32
    %20 = vector.broadcast %cst_11 : f32 to vector<16x512xf32>
    %21 = arith.addf %19, %20 : vector<16x512xf32>
    %22 = arith.mulf %21, %14 : vector<16x512xf32>
    %cst_12 = arith.constant -0.284496725 : f32
    %23 = vector.broadcast %cst_12 : f32 to vector<16x512xf32>
    %24 = arith.addf %22, %23 : vector<16x512xf32>
    %25 = arith.mulf %24, %14 : vector<16x512xf32>
    %cst_13 = arith.constant 0.254829586 : f32
    %26 = vector.broadcast %cst_13 : f32 to vector<16x512xf32>
    %27 = arith.addf %25, %26 : vector<16x512xf32>
    %28 = arith.mulf %27, %14 : vector<16x512xf32>
    %29 = arith.mulf %8, %8 : vector<16x512xf32>
    %cst_14 = arith.constant 0.000000e+00 : f32
    %30 = vector.broadcast %cst_14 : f32 to vector<16x512xf32>
    %31 = arith.subf %30, %29 : vector<16x512xf32>
    %32 = math.exp %31 : vector<16x512xf32>
    %33 = arith.mulf %28, %32 : vector<16x512xf32>
    %cst_15 = arith.constant 1.000000e+00 : f32
    %34 = vector.broadcast %cst_15 : f32 to vector<16x512xf32>
    %35 = arith.subf %34, %33 : vector<16x512xf32>
    %cst_16 = arith.constant 0.000000e+00 : f32
    %36 = vector.broadcast %cst_16 : f32 to vector<16x512xf32>
    %37 = arith.cmpf olt, %7, %36 : vector<16x512xf32>
    %cst_17 = arith.constant 0.000000e+00 : f32
    %38 = vector.broadcast %cst_17 : f32 to vector<16x512xf32>
    %39 = arith.subf %38, %35 : vector<16x512xf32>
    %40 = arith.select %37, %39, %35 : vector<16x512xi1>, vector<16x512xf32>
    %cst_18 = arith.constant 5.000000e-01 : f32
    %41 = vector.broadcast %cst_18 : f32 to vector<16x512xf32>
    %42 = arith.mulf %41, %5 : vector<16x512xf32>
    %cst_19 = arith.constant 1.000000e+00 : f32
    %43 = vector.broadcast %cst_19 : f32 to vector<16x512xf32>
    %44 = arith.addf %43, %40 : vector<16x512xf32>
    %45 = arith.mulf %42, %44 : vector<16x512xf32>
    %c0_20 = arith.constant 0 : index
    %c0_21 = arith.constant 0 : index
    %46 = vector.load %arg5[%c0_20, %c0_21] : memref<16x512xf32, #tpu.memory_space<vmem>>, vector<16x512xf32>
    tpu.vector_store %arg5[%c0_20, %c0_21], %45 {strides = array<i32>} : memref<16x512xf32, #tpu.memory_space<vmem>>, vector<16x512xf32>,
    return
  }
  func.func @transform_0(%arg0: i32, %arg1: i32) -> (i32, i32) {
    %c0_i32 = arith.constant 0 : i32
    %c0_i32_0 = arith.constant 0 : i32
    return %arg1, %c0_i32 : i32, i32
  }
  func.func @transform_1(%arg0: i32, %arg1: i32) -> (i32, i32) {
    %c0_i32 = arith.constant 0 : i32
    %c0_i32_0 = arith.constant 0 : i32
    return %arg0, %c0_i32 : i32, i32
  }
  func.func @transform_2(%arg0: i32, %arg1: i32) -> (i32, i32) {
    %c0_i32 = arith.constant 0 : i32
    %c0_i32_0 = arith.constant 0 : i32
    return %c0_i32, %arg0 : i32, i32
  }
  func.func @transform_3(%arg0: i32, %arg1: i32) -> (i32, i32) {
    %c0_i32 = arith.constant 0 : i32
    return %arg1, %arg0 : i32, i32
  }
}

</mosaic_0001>

<bundles_post_ra>
// kernel: tpu_custom_call.1
= control target key start
LH: loop header
LB: loop body
LE: loop exit
PB: predicated region body
PF: predicated region fallthrough
CT: control target
= control target key end

     0   :  { %8 = vsyncpa [#allocation3], 0  ;;  %s1062_s0 = inlined_call_operand.hbm [shape: bf16[16,128], index: 0, kind: input, shape index: {}]   ;;  %s1063_s1 = inlined_call_operand.hbm [shape: bf16[512,128], index: 1, kind: input, shape index: {}]   ;;  %s1064_s2 = inlined_call_operand.vmem [shape: f32[1,512], index: 2, kind: input, shape index: {}]   ;;  %s1065_s3 = inlined_call_operand.hbm [shape: f32[16,512], index: 3, kind: output, shape index: {}]  }
   0x1   :  { %9 = vsyncpa [#allocation6], 0 }
   0x2   :  { %10 = vsyncpa [#allocation4], 0  ;;  %s871_s12 = smov [#allocation2]   ;;  %s799_s16 = scalar_lea.hbm %s1062_s0, 128 }
   0x3   :  { %s16_s13 = sshll.u32 %s871_s12, 4  ;;  %p800_p0 = scmp.ne.s32.totalorder %s1062_s0, %s799_s16  ;;  %s17_s13 = int_to_ptr.vmem [resolvable:$true] %s16_s13 }
   0x4   :  { %p803_p1 = scmp.lt.u32.totalorder %s799_s16, %s1062_s0 }
   0x6   :  { %p805_p2 = pnand %p803_p1, %p800_p0 }
   0x8   :  { %808 = shalt.err (!%p805_p2)
}
   0x9   :  { %s809_s21 = scalar_lea.vmem %s17_s13, 128  ;;  %p814_p4 = scmp.lt.s32.totalorder %s17_s13, %s17_s13 }
   0xa   :  { %p810_p3 = scmp.ne.s32.totalorder %s17_s13, %s809_s21  ;;  %p815_p5 = scmp.lt.s32.totalorder %s809_s21, %s809_s21 }
   0xc   :  { %p816_p6 = por %p815_p5, %p814_p4 }
   0xe   :  { %p817_p7 = pnand %p816_p6, %p810_p3 }
  0x10   :  { %820 = shalt.err (!%p817_p7)
}
  0x11   :  { %s872_s22 = smov 64   ;;  %s873_s23 = smov 4  }
  0x12   :  { %22 = dma.hbm_to_vmem [thread:$0]  %s1062_s0, 128, %s17_s13, [#allocation3], %s872_s22, %s872_s22, %s873_s23  }
  0x13   :  { %s874_s26 = smov [#allocation5]   ;;  %s821_s30 = scalar_lea.hbm %s1063_s1, 4096 }
  0x14   :  { %s28_s27 = sshll.u32 %s874_s26, 4  ;;  %p822_p8 = scmp.ne.s32.totalorder %s1063_s1, %s821_s30  ;;  %s29_s27 = int_to_ptr.vmem [resolvable:$true] %s28_s27 }
  0x15   :  { %p825_p9 = scmp.lt.u32.totalorder %s821_s30, %s1063_s1 }
  0x17   :  { %p827_p10 = pnand %p825_p9, %p822_p8 }
  0x19   :  { %830 = shalt.err (!%p827_p10)
}
  0x1a   :  { %s831_s8 = scalar_lea.vmem %s29_s27, 4096  ;;  %p836_p12 = scmp.lt.s32.totalorder %s29_s27, %s29_s27 }
  0x1b   :  { %p832_p11 = scmp.ne.s32.totalorder %s29_s27, %s831_s8  ;;  %p837_p13 = scmp.lt.s32.totalorder %s831_s8, %s831_s8 }
  0x1d   :  { %p838_p0 = por %p837_p13, %p836_p12 }
  0x1f   :  { %p839_p1 = pnand %p838_p0, %p832_p11 }
  0x21   :  { %842 = shalt.err (!%p839_p1)
}
  0x22   :  { %34 = dma.hbm_to_vmem [thread:$0]  %s1063_s1, 4096, %s29_s27, [#allocation6], %s872_s22, %s872_s22, %s873_s23  }
  0x23   :  { %865 = dma.done.wait [#allocation3], 128  }
  0x24   :  { %866 = vsyncadd [#allocation3], 4294967168 }
  0x25   :  { %867 = dma.done.wait [#allocation6], 4096  }
  0x26   :  { %868 = vsyncadd [#allocation6], 4294963200  ;;  %v734_v0 = vld [vmem:[#allocation5 + $0x40] sm:$0xff]   ;;  %v738_v4 = vld [vmem:[#allocation5 + $0x48] sm:$0xff]   ;;  %v112_v33 = vlaneseq }
  0x27   :  { %v735_v1 = vld [vmem:[#allocation5 + $0xc0] sm:$0xff]   ;;  %691 = vmatprep.subr.bf16.mxu0 %v734_v0  ;;  %v739_v5 = vld [vmem:[#allocation5 + $0xc8] sm:$0xff]   ;;  %v742_v8 = vld [vmem:[#allocation5 + $0x50] sm:$0xff]  }
  0x28   :  { %v736_v2 = vld [vmem:[#allocation5] sm:$0xff]   ;;  %709 = vmatprep.subr.bf16.mxu1 %v735_v1  ;;  %v740_v6 = vld [vmem:[#allocation5 + $0x8] sm:$0xff]   ;;  %v743_v9 = vld [vmem:[#allocation5 + $0xd0] sm:$0xff]   ;;  %v113_v34 = vshrl.u32 %v112_v33, 7 }
  0x29   :  { %v737_v3 = vld [vmem:[#allocation5 + $0x80] sm:$0xff]   ;;  %692 = vmatpush3.bf16.xpose.msra.mxu0 %v736_v2  ;;  %v741_v7 = vld [vmem:[#allocation5 + $0x88] sm:$0xff]   ;;  %v744_v10 = vld [vmem:[#allocation5 + $0x10] sm:$0xff]  }
  0x2a   :  { %710 = vmatpush3.bf16.xpose.msra.mxu1 %v737_v3  ;;  %693 = vmatprep.subr.bf16.mxu0 %v738_v4  ;;  %v745_v11 = vld [vmem:[#allocation5 + $0x90] sm:$0xff]   ;;  %v746_v12 = vld [vmem:[#allocation5 + $0x58] sm:$0xff]   ;;  %v750_v16 = vld [vmem:[#allocation5 + $0x60] sm:$0xff]   ;;  %v114_v35 = vsub.s32 0, %v113_v34  ;;  %v122_v37 = vsub.s32 2, %v113_v34  ;;  %v118_v38 = vsub.s32 1, %v113_v34 }
  0x2b   :  { %711 = vmatprep.subr.bf16.mxu1 %v739_v5  ;;  %v747_v13 = vld [vmem:[#allocation5 + $0xd8] sm:$0xff]   ;;  %v751_v17 = vld [vmem:[#allocation5 + $0xe0] sm:$0xff]   ;;  %v754_v21 = vld [vmem:[#allocation5 + $0x68] sm:$0xff]   ;;  %v126_v39 = vsub.s32 3, %v113_v34 }
  0x2c   :  { %v748_v14 = vld [vmem:[#allocation5 + $0x18] sm:$0xff]   ;;  %v752_v18 = vld [vmem:[#allocation5 + $0x20] sm:$0xff]   ;;  %v755_v22 = vld [vmem:[#allocation5 + $0xe8] sm:$0xff]  }
  0x2d   :  { %v749_v15 = vld [vmem:[#allocation5 + $0x98] sm:$0xff]   ;;  %v753_v20 = vld [vmem:[#allocation5 + $0xa0] sm:$0xff]   ;;  %v756_v23 = vld [vmem:[#allocation5 + $0x28] sm:$0xff]  }
  0x2e   :  { %v766_v19 = vld [vmem:[#allocation2] sm:$0xff]   ;;  %v757_v24 = vld [vmem:[#allocation5 + $0xa8] sm:$0xff]   ;;  %v758_v25 = vld [vmem:[#allocation5 + $0x70] sm:$0xff]  }
  0x2f   :  { %707 = vmatprep.mubr.bf16.mxu0 %v766_v19  ;;  %725 = vmatprep.mubr.bf16.mxu1 %v766_v19  ;;  %v759_v26 = vld [vmem:[#allocation5 + $0xf0] sm:$0xff]   ;;  %v762_v29 = vld [vmem:[#allocation5 + $0x78] sm:$0xff]  }
  0x30   :  { %v760_v27 = vld [vmem:[#allocation5 + $0x30] sm:$0xff]   ;;  %v763_v30 = vld [vmem:[#allocation5 + $0xf8] sm:$0xff]  }
  0x31   :  { %694 = vmatpush3.bf16.xpose.msra.mxu0 %v740_v6  ;;  %v761_v28 = vld [vmem:[#allocation5 + $0xb0] sm:$0xff]   ;;  %v764_v31 = vld [vmem:[#allocation5 + $0x38] sm:$0xff]  }
  0x32   :  { %712 = vmatpush3.bf16.xpose.msra.mxu1 %v741_v7  ;;  %695 = vmatprep.subr.bf16.mxu0 %v742_v8  ;;  %v765_v32 = vld [vmem:[#allocation5 + $0xb8] sm:$0xff]  }
  0x33   :  { %713 = vmatprep.subr.bf16.mxu1 %v743_v9  ;;  %v110_v36 = vld [vmem:[%s1064_s2] sm:$0xf]  ;;  %s875_s2 = smov [#allocation7]  }
  0x34   :  { %v115_v40 = vrot.slane %v110_v36, %v114_v35  ;;  %v123_v41 = vrot.slane %v110_v36, %v122_v37  ;;  %v119_v42 = vrot.slane %v110_v36, %v118_v38  ;;  %v127_v43 = vrot.slane %v110_v36, %v126_v39  ;;  %s645_s11 = sshll.u32 %s875_s2, 4  ;;  %s646_s11 = int_to_ptr.vmem [resolvable:$true] %s645_s11 }
  0x35   :  { %s843_s12 = scalar_lea.vmem %s646_s11, 1024  ;;  %p848_p3 = scmp.lt.s32.totalorder %s646_s11, %s646_s11 }
  0x36   :  { %p844_p2 = scmp.ne.s32.totalorder %s646_s11, %s843_s12  ;;  %p849_p4 = scmp.lt.s32.totalorder %s843_s12, %s843_s12 }
  0x38   :  { %p850_p5 = por %p849_p4, %p848_p3 }
  0x39   :  { %696 = vmatpush3.bf16.xpose.msra.mxu0 %v744_v10 }
  0x3a   :  { %714 = vmatpush3.bf16.xpose.msra.mxu1 %v745_v11  ;;  %697 = vmatprep.subr.bf16.mxu0 %v746_v12  ;;  %p851_p6 = pnand %p850_p5, %p844_p2 }
  0x3b   :  { %715 = vmatprep.subr.bf16.mxu1 %v747_v13 }
  0x41   :  { %698 = vmatpush3.bf16.xpose.msra.mxu0 %v748_v14 }
  0x42   :  { %716 = vmatpush3.bf16.xpose.msra.mxu1 %v749_v15  ;;  %699 = vmatprep.subr.bf16.mxu0 %v750_v16 }
  0x43   :  { %717 = vmatprep.subr.bf16.mxu1 %v751_v17 }
  0x49   :  { %700 = vmatpush3.bf16.xpose.msra.mxu0 %v752_v18 }
  0x4a   :  { %718 = vmatpush3.bf16.xpose.msra.mxu1 %v753_v20  ;;  %701 = vmatprep.subr.bf16.mxu0 %v754_v21 }
  0x4b   :  { %719 = vmatprep.subr.bf16.mxu1 %v755_v22 }
  0x51   :  { %702 = vmatpush3.bf16.xpose.msra.mxu0 %v756_v23 }
  0x52   :  { %720 = vmatpush3.bf16.xpose.msra.mxu1 %v757_v24  ;;  %703 = vmatprep.subr.bf16.mxu0 %v758_v25 }
  0x53   :  { %721 = vmatprep.subr.bf16.mxu1 %v759_v26 }
  0x59   :  { %704 = vmatpush3.bf16.xpose.msra.mxu0 %v760_v27 }
  0x5a   :  { %722 = vmatpush3.bf16.xpose.msra.mxu1 %v761_v28  ;;  %705 = vmatprep.subr.bf16.mxu0 %v762_v29 }
  0x5b   :  { %723 = vmatprep.subr.bf16.mxu1 %v763_v30 }
  0x61   :  { %706 = vmatpush3.bf16.xpose.msra.mxu0 %v764_v31 }
  0x62   :  { %724 = vmatpush3.bf16.xpose.msra.mxu1 %v765_v32 }
  0x68   :  { %708 = vmatmul.mubr.bf16.vlgmr.msra.gmra.mrb[0].mxu0 %v766_v19 }
  0x69   :  { %726 = vmatmul.mubr.bf16.vlgmr.msra.gmra.mrb[0].mxu1 %v766_v19 }
 0x13b   :  { %v364_v44 = vpop.f32.mrb[0].mxu0 }
 0x13c   :  { %v365_v45 = vadd.f32 %v364_v44, %v115_v40  ;;  %v407_v46 = vpop.f32.mrb[0].mxu1  ;;  %v366_v47 = vpop.f32.mrb[1].mxu0 }
 0x13d   :  { %v408_v48 = vadd.f32 %v407_v46, %v123_v41  ;;  %v367_v49 = vadd.f32 %v366_v47, %v119_v42  ;;  %v409_v50 = vpop.f32.mrb[1].mxu1  ;;  %v368_v51 = vpop.f32.mrb[2].mxu0 }
 0x13e   :  { %v925_v52 = vmul.f32 0.70710677, %v365_v45  ;;  %v927_v53 = vadd.f32 %v409_v50, %v127_v43  ;;  %v411_v54 = vpop.f32.mrb[2].mxu1  ;;  %v370_v55 = vpop.f32.mrb[3].mxu0  ;;  %v940_v3 = vadd.f32 %v368_v51, %v115_v40  ;;  %v958_v19 = vmul.f32 0.5, %v365_v45 }
 0x13f   :  { %v929_v56 = vmul.f32 0.70710677, %v408_v48  ;;  %v931_v57 = vmul.f32 0.70710677, %v367_v49  ;;  %v413_v0 = vpop.f32.mrb[3].mxu1  ;;  %v945_v10 = vadd.f32 %v411_v54, %v123_v41  ;;  %v948_v12 = vadd.f32 %v370_v55, %v119_v42 }
 0x140   :  { %v424_v58 = vand.u32 2147483647, %v925_v52  ;;  %v935_v59 = vmul.f32 0.70710677, %v927_v53  ;;  %v943_v8 = vmul.f32 0.70710677, %v940_v3  ;;  %v953_v14 = vadd.f32 %v413_v0, %v127_v43 }
 0x141   :  { %v426_v60 = vand.u32 2147483647, %v929_v56  ;;  %v425_v61 = vand.u32 2147483647, %v931_v57  ;;  %v951_v13 = vmul.f32 0.70710677, %v945_v10 }
 0x142   :  { %v432_v62 = vmul.f32 0.3275911, %v424_v58  ;;  %v427_v63 = vand.u32 2147483647, %v935_v59  ;;  %v428_v11 = vand.u32 2147483647, %v943_v8  ;;  %v536_v15 = vmul.f32 %v424_v58, %v424_v58 }
 0x143   :  { %v434_v1 = vmul.f32 0.3275911, %v426_v60  ;;  %v433_v2 = vmul.f32 0.3275911, %v425_v61  ;;  %v538_v16 = vmul.f32 %v426_v60, %v426_v60  ;;  %v956_v18 = vmul.f32 0.70710677, %v948_v12 }
 0x144   :  { %v440_v4 = vadd.f32 1.0, %v432_v62  ;;  %v435_v5 = vmul.f32 0.3275911, %v427_v63  ;;  %v436_v17 = vmul.f32 0.3275911, %v428_v11  ;;  %v537_v21 = vmul.f32 %v425_v61, %v425_v61 }
 0x145   :  { %v442_v6 = vadd.f32 1.0, %v434_v1  ;;  %v441_v7 = vadd.f32 1.0, %v433_v2  ;;  %v430_v20 = vand.u32 2147483647, %v951_v13  ;;  %v539_v22 = vmul.f32 %v427_v63, %v427_v63 }
 0x146   :  { %767 = vrcp.f32 %v440_v4  ;;  %v443_v9 = vadd.f32 1.0, %v435_v5  ;;  %v444_v23 = vadd.f32 1.0, %v436_v17  ;;  %v429_v24 = vand.u32 2147483647, %v956_v18 }
 0x147   :  { %769 = vrcp.f32 %v442_v6  ;;  %v962_v25 = vmul.f32 0.5, %v408_v48  ;;  %v540_v26 = vmul.f32 %v428_v11, %v428_v11  ;;  %v438_v27 = vmul.f32 0.3275911, %v430_v20 }
 0x148   :  { %771 = vrcp.f32 %v441_v7  ;;  %v965_v28 = vmul.f32 0.70710677, %v953_v14  ;;  %v544_v29 = vsub.f32 0.0, %v536_v15  ;;  %v546_v30 = vsub.f32 0.0, %v538_v16 }
 0x149   :  { %773 = vrcp.f32 %v443_v9  ;;  %v437_v31 = vmul.f32 0.3275911, %v429_v24  ;;  %v969_v33 = vmul.f32 0.5, %v367_v49  ;;  %v446_v34 = vadd.f32 1.0, %v438_v27 }
 0x14a   :  { %775 = vrcp.f32 %v444_v23  ;;  %v542_v35 = vmul.f32 %v430_v20, %v430_v20  ;;  %v431_v36 = vand.u32 2147483647, %v965_v28  ;;  %v545_v39 = vsub.f32 0.0, %v537_v21 }
 0x14b   :  { %v547_v40 = vsub.f32 0.0, %v539_v22  ;;  %v445_v41 = vadd.f32 1.0, %v437_v31  ;;  %v548_v43 = vsub.f32 0.0, %v540_v26  ;;  %777 = vrcp.f32 %v446_v34 }
 0x14c   :  { %v439_v44 = vmul.f32 0.3275911, %v431_v36  ;;  %v552_v46 = vmul.f32 1.442695, %v544_v29  ;;  %v556_v47 = vmul.f32 1.442695, %v546_v30  ;;  %v541_v51 = vmul.f32 %v429_v24, %v429_v24 }
 0x14d   :  { %779 = vrcp.f32 %v445_v41  ;;  %v550_v50 = vsub.f32 0.0, %v542_v35  ;;  %v554_v60 = vmul.f32 1.442695, %v545_v39  ;;  %v558_v61 = vmul.f32 1.442695, %v547_v40 }
 0x14e   :  { %v447_v54 = vadd.f32 1.0, %v439_v44  ;;  %v560_v0 = vmul.f32 1.442695, %v548_v43  ;;  %v543_v1 = vmul.f32 %v431_v36, %v431_v36  ;;  %v549_v9 = vsub.f32 0.0, %v541_v51 }
 0x14f   :  { %v564_v7 = vmul.f32 1.442695, %v550_v50  ;;  %vm584_vm0 = vcmp.lt.f32.partialorder %v925_v52, 0.0  ;;  %vm586_vm1 = vcmp.lt.f32.partialorder %v929_v56, 0.0  ;;  %vm585_vm2 = vcmp.lt.f32.partialorder %v931_v57, 0.0 }
 0x150   :  { %v967_v32 = vpop.eup %767  ;;  %781 = vrcp.f32 %v447_v54  ;;  %v551_v22 = vsub.f32 0.0, %v543_v1  ;;  %v562_v31 = vmul.f32 1.442695, %v549_v9  ;;  %vm587_vm3 = vcmp.lt.f32.partialorder %v935_v59, 0.0 }
 0x151   :  { %v972_v37 = vpop.eup %769  ;;  %v464_v38 = vmul.f32 1.0614054, %v967_v32  ;;  %783 = vpow2.f32 %v552_v46  ;;  %vm588_vm4 = vcmp.lt.f32.partialorder %v943_v8, 0.0  ;;  %v612_v59 = vmul.f32 0.5, %v940_v3 }
 0x152   :  { %v466_v42 = vmul.f32 1.0614054, %v972_v37  ;;  %v976_v48 = vpop.eup %771  ;;  %785 = vpow2.f32 %v556_v47  ;;  %v566_v43 = vmul.f32 1.442695, %v551_v22  ;;  %vm590_vm5 = vcmp.lt.f32.partialorder %v951_v13, 0.0 }
 0x153   :  { %v472_v45 = vadd.f32 -1.4531521, %v464_v38  ;;  %v465_v58 = vmul.f32 1.0614054, %v976_v48  ;;  %v980_v62 = vpop.eup %773  ;;  %787 = vpow2.f32 %v554_v60  ;;  %vm589_vm6 = vcmp.lt.f32.partialorder %v956_v18, 0.0 }
 0x154   :  { %v474_v49 = vadd.f32 -1.4531521, %v466_v42  ;;  %v467_v5 = vmul.f32 1.0614054, %v980_v62  ;;  %v984_v11 = vpop.eup %775  ;;  %789 = vpow2.f32 %v558_v61  ;;  %v613_v3 = vmul.f32 0.5, %v948_v12 }
 0x155   :  { %v480_v55 = vmul.f32 %v967_v32, %v472_v45  ;;  %v473_v4 = vadd.f32 -1.4531521, %v465_v58  ;;  %v468_v21 = vmul.f32 1.0614054, %v984_v11  ;;  %791 = vpow2.f32 %v560_v0  ;;  %v991_v27 = vpop.eup %777 }
 0x156   :  { %v482_v63 = vmul.f32 %v972_v37, %v474_v49  ;;  %v475_v17 = vadd.f32 -1.4531521, %v467_v5  ;;  %793 = vpow2.f32 %v564_v7  ;;  %v470_v39 = vmul.f32 1.0614054, %v991_v27 }
 0x157   :  { %v488_v2 = vadd.f32 1.4214138, %v480_v55  ;;  %v481_v16 = vmul.f32 %v976_v48, %v473_v4  ;;  %v476_v30 = vadd.f32 -1.4531521, %v468_v21  ;;  %v993_v34 = vpop.eup %779  ;;  %795 = vpow2.f32 %v562_v31 }
 0x158   :  { %v490_v6 = vadd.f32 1.4214138, %v482_v63  ;;  %v483_v26 = vmul.f32 %v980_v62, %v475_v17  ;;  %v469_v42 = vmul.f32 1.0614054, %v993_v34  ;;  %v478_v47 = vadd.f32 -1.4531521, %v470_v39 }
 0x159   :  { %v496_v15 = vmul.f32 %v967_v32, %v488_v2  ;;  %v489_v24 = vadd.f32 1.4214138, %v481_v16  ;;  %v484_v41 = vmul.f32 %v984_v11, %v476_v30  ;;  %797 = vpow2.f32 %v566_v43 }
 0x15a   :  { %v498_v20 = vmul.f32 %v972_v37, %v490_v6  ;;  %v491_v38 = vadd.f32 1.4214138, %v483_v26  ;;  %v1002_v49 = vpop.eup %781  ;;  %v477_v54 = vadd.f32 -1.4531521, %v469_v42  ;;  %v486_v63 = vmul.f32 %v991_v27, %v478_v47 }
 0x15b   :  { %v504_v23 = vadd.f32 -0.28449672, %v496_v15  ;;  %v497_v36 = vmul.f32 %v976_v48, %v489_v24  ;;  %v492_v51 = vadd.f32 1.4214138, %v484_v41  ;;  %v784_v55 = vpop.eup %783  ;;  %v471_v5 = vmul.f32 1.0614054, %v1002_v49 }
 0x15c   :  { %v506_v29 = vadd.f32 -0.28449672, %v498_v20  ;;  %v499_v46 = vmul.f32 %v980_v62, %v491_v38  ;;  %v786_v0 = vpop.eup %785  ;;  %v485_v4 = vmul.f32 %v993_v34, %v477_v54  ;;  %v494_v15 = vadd.f32 1.4214138, %v486_v63 }
 0x15d   :  { %v512_v35 = vmul.f32 %v967_v32, %v504_v23  ;;  %v505_v45 = vadd.f32 -0.28449672, %v497_v36  ;;  %v500_v2 = vmul.f32 %v984_v11, %v492_v51  ;;  %v788_v6 = vpop.eup %787  ;;  %v479_v22 = vadd.f32 -1.4531521, %v471_v5 }
 0x15e   :  { %v514_v40 = vmul.f32 %v972_v37, %v506_v29  ;;  %v507_v61 = vadd.f32 -0.28449672, %v499_v46  ;;  %v790_v16 = vpop.eup %789  ;;  %v493_v21 = vadd.f32 1.4214138, %v485_v4  ;;  %v502_v29 = vmul.f32 %v991_v27, %v494_v15 }
 0x15f   :  { %v520_v44 = vadd.f32 0.2548296, %v512_v35  ;;  %v513_v60 = vmul.f32 %v976_v48, %v505_v45  ;;  %v508_v20 = vadd.f32 -0.28449672, %v500_v2  ;;  %v487_v45 = vmul.f32 %v1002_v49, %v479_v22 }
 0x160   :  { %v522_v50 = vadd.f32 0.2548296, %v514_v40  ;;  %v501_v36 = vmul.f32 %v993_v34, %v493_v21  ;;  %v510_v41 = vadd.f32 -0.28449672, %v502_v29  ;;  %vm591_vm7 = vcmp.lt.f32.partialorder %v965_v28, 0.0 }
 0x161   :  { %v528_v58 = vmul.f32 %v967_v32, %v520_v44  ;;  %v521_v9 = vadd.f32 0.2548296, %v513_v60  ;;  %v515_v32 = vmul.f32 %v980_v62, %v507_v61  ;;  %v516_v35 = vmul.f32 %v984_v11, %v508_v20 }
 0x162   :  { %v530_v1 = vmul.f32 %v972_v37, %v522_v50  ;;  %v792_v37 = vpop.eup %791  ;;  %v518_v51 = vmul.f32 %v991_v27, %v510_v41  ;;  %v495_v4 = vadd.f32 1.4214138, %v487_v45  ;;  %v615_v18 = vmul.f32 0.5, %v953_v14 }
 0x163   :  { %v568_v7 = vmul.f32 %v784_v55, %v528_v58  ;;  %v529_v24 = vmul.f32 %v976_v48, %v521_v9  ;;  %v523_v26 = vadd.f32 0.2548296, %v515_v32  ;;  %v794_v30 = vpop.eup %793  ;;  %v524_v44 = vadd.f32 0.2548296, %v516_v35 }
 0x164   :  { %v570_v17 = vmul.f32 %v786_v0, %v530_v1  ;;  %v509_v48 = vadd.f32 -0.28449672, %v501_v36  ;;  %v796_v54 = vpop.eup %795  ;;  %v526_v0 = vadd.f32 0.2548296, %v518_v51  ;;  %v503_v15 = vmul.f32 %v1002_v49, %v495_v4 }
 0x165   :  { %v576_v23 = vsub.f32 1.0, %v568_v7  ;;  %v569_v39 = vmul.f32 %v788_v6, %v529_v24  ;;  %v531_v40 = vmul.f32 %v980_v62, %v523_v26  ;;  %v532_v62 = vmul.f32 %v984_v11, %v524_v44 }
 0x166   :  { %v578_v31 = vsub.f32 1.0, %v570_v17  ;;  %v517_v58 = vmul.f32 %v993_v34, %v509_v48  ;;  %v534_v7 = vmul.f32 %v991_v27, %v526_v0  ;;  %v798_v17 = vpop.eup %797  ;;  %v614_v35 = vmul.f32 0.5, %v945_v10 }
 0x167   :  { %v592_v38 = vsub.f32 0.0, %v576_v23  ;;  %v577_v47 = vsub.f32 1.0, %v569_v39  ;;  %v571_v50 = vmul.f32 %v790_v16, %v531_v40  ;;  %v572_v1 = vmul.f32 %v792_v37, %v532_v62 }
 0x168   :  { %v594_v42 = vsub.f32 0.0, %v578_v31  ;;  %v525_v2 = vadd.f32 0.2548296, %v517_v58  ;;  %v611_v16 = vmul.f32 0.5, %v927_v53  ;;  %v511_v37 = vadd.f32 -0.28449672, %v503_v15 }
 0x169   :  { %v600_v46 = vsel %vm584_vm0, %v592_v38, %v576_v23  ;;  %v593_v61 = vsub.f32 0.0, %v577_v47  ;;  %v579_v63 = vsub.f32 1.0, %v571_v50  ;;  %v580_v9 = vsub.f32 1.0, %v572_v1 }
 0x16a   :  { %v616_v55 = vadd.f32 1.0, %v600_v46  ;;  %v602_v43 = vsel %vm586_vm1, %v594_v42, %v578_v31  ;;  %v533_v32 = vmul.f32 %v993_v34, %v525_v2  ;;  %v519_v53 = vmul.f32 %v1002_v49, %v511_v37 }
 0x16b   :  { %v618_v60 = vadd.f32 1.0, %v602_v43  ;;  %v601_v6 = vsel %vm585_vm2, %v593_v61, %v577_v47  ;;  %v595_v56 = vsub.f32 0.0, %v579_v63  ;;  %v596_v21 = vsub.f32 0.0, %v580_v9 }
 0x16c   :  { %v624_v52 = vmul.f32 %v616_v55, %v958_v19  ;;  %v617_v11 = vadd.f32 1.0, %v601_v6  ;;  %v573_v27 = vmul.f32 %v796_v54, %v533_v32  ;;  %v527_v8 = vadd.f32 0.2548296, %v519_v53 }
 0x16d   :  { %v626_v5 = vmul.f32 %v618_v60, %v962_v25  ;;  %v603_v19 = vsel %vm587_vm3, %v595_v56, %v579_v63  ;;  %v574_v25 = vmul.f32 %v794_v30, %v534_v7  ;;  %v604_v23 = vsel %vm588_vm4, %v596_v21, %v580_v9 }
 0x16e   :  { %632 = vst [vmem:[#allocation7] sm:$0xff] %v624_v52  ;;  %v625_v57 = vmul.f32 %v617_v11, %v969_v33  ;;  %v619_v20 = vadd.f32 1.0, %v603_v19  ;;  %v581_v24 = vsub.f32 1.0, %v573_v27  ;;  %v620_v26 = vadd.f32 1.0, %v604_v23 }
 0x16f   :  { %634 = vst [vmem:[#allocation7 + $0x10] sm:$0xff] %v626_v5  ;;  %v582_v22 = vsub.f32 1.0, %v574_v25  ;;  %v535_v40 = vmul.f32 %v1002_v49, %v527_v8 }
 0x170   :  { %633 = vst [vmem:[#allocation7 + $0x8] sm:$0xff] %v625_v57  ;;  %v627_v34 = vmul.f32 %v619_v20, %v611_v16  ;;  %v597_v33 = vsub.f32 0.0, %v581_v24  ;;  %v628_v30 = vmul.f32 %v620_v26, %v612_v59 }
 0x171   :  { %v598_v29 = vsub.f32 0.0, %v582_v22  ;;  %v575_v44 = vmul.f32 %v798_v17, %v535_v40 }
 0x172   :  { %635 = vst [vmem:[#allocation7 + $0x18] sm:$0xff] %v627_v34  ;;  %v605_v38 = vsel %vm589_vm6, %v597_v33, %v581_v24  ;;  %636 = vst [vmem:[#allocation7 + $0x20] sm:$0xff] %v628_v30 }
 0x173   :  { %v606_v31 = vsel %vm590_vm5, %v598_v29, %v582_v22  ;;  %v621_v39 = vadd.f32 1.0, %v605_v38  ;;  %v583_v13 = vsub.f32 1.0, %v575_v44 }
 0x174   :  { %v622_v36 = vadd.f32 1.0, %v606_v31 }
 0x175   :  { %v629_v42 = vmul.f32 %v621_v39, %v613_v3  ;;  %v599_v48 = vsub.f32 0.0, %v583_v13 }
 0x176   :  { %v630_v41 = vmul.f32 %v622_v36, %v614_v35 }
 0x177   :  { %637 = vst [vmem:[#allocation7 + $0x28] sm:$0xff] %v629_v42  ;;  %v607_v10 = vsel %vm591_vm7, %v599_v48, %v583_v13 }
 0x178   :  { %638 = vst [vmem:[#allocation7 + $0x30] sm:$0xff] %v630_v41  ;;  %v623_v45 = vadd.f32 1.0, %v607_v10 }
 0x17a   :  { %v631_v12 = vmul.f32 %v623_v45, %v615_v18 }
 0x17c   :  { %639 = vst [vmem:[#allocation7 + $0x38] sm:$0xff] %v631_v12 }
 0x17d   :  { %854 = shalt.err (!%p851_p6)
}
 0x17e   :  { %s855_s15 = scalar_lea.hbm %s1065_s3, 1024 }
 0x17f   :  { %p856_p7 = scmp.ne.s32.totalorder %s1065_s3, %s855_s15  ;;  %p859_p8 = scmp.lt.u32.totalorder %s855_s15, %s1065_s3 }
 0x181   :  { %p861_p9 = pnand %p859_p8, %p856_p7 }
 0x183   :  { %864 = shalt.err (!%p861_p9)
}
 0x184   :  { %s876_s20 = smov 512   ;;  %s877_s21 = smov 32  }
 0x185   :  { %651 = dma.vmem_to_hbm [thread:$0]  %s646_s11, 1024, %s1065_s3, [#allocation4], %s876_s20, %s876_s20, %s877_s21  }
 0x186   :  { %869 = dma.done.wait [#allocation4], 1024  }
 0x187   :  { %870 = vsyncadd [#allocation4], 4294966272 }
 0x188   :  { %655 = vsyncpa [#allocation3], 1 }
 0x189   :  { %656 = vsyncpa [#allocation6], 1 }
 0x18a   :  { %657 = vsyncpa [#allocation4], 1 }

</bundles_post_ra>
